<compile_context>
chip_gen: v7x
topology: tpu7x:2x2x1
jax: 0.10.0
libtpu: 0.0.40
codegen_flags: <defaults>
</compile_context>

<pallas_src>
import functools

import jax
import jax.numpy as jnp
from jax import lax
from jax.experimental import pallas as pl
from jax.experimental.pallas import tpu as pltpu


# ------------------------------------------------------------------ tiling --

def _choose_tiling(n):
    """Row-tile size / padded row count for (tile_rows, n_pad) distance slabs.

    Budget: ~3 live (tr, n_pad) f32 temporaries <= ~24 MiB so the kernel stays
    well inside the 48 MiB requested VMEM (v7x has only 64 MiB physical).
    """
    n8 = -(-n // 8) * 8                                   # sublane-align rows
    cap = max(8, ((2 * 1024 * 1024) // max(n8, 1)) // 8 * 8)
    tr = min(n8, 512, cap)
    g = -(-n // tr)
    n_pad = g * tr
    return tr, n_pad, g


# ------------------------------------------------------------------ kernel --

def _partial_stats_kernel(x_ref, mu_ref, us_ref, shift_ref, s1_ref, s2_ref,
                          *, n_valid, n_pad, tile_rows):
    """One (tile_rows, n_pad) slab of the whitened pairwise sq-dist matrix.

    Emits shifted partial sums for this row tile in a single pass.  Each grid
    step owns its own output slot, so the row axis is safe to mark "parallel"
    (v7x megacore: per-core partials, combined in XLA afterwards).
    """
    i = pl.program_id(0)
    d_feat = x_ref.shape[1]
    shift = shift_ref[0, 0]                       # SMEM scalar (= dist mean)

    mu = mu_ref[...]
    us = us_ref[...]
    # Centering + whitening projection fused in-kernel; x (raw, padded) is
    # resident in VMEM across all grid steps -> no xc/xw HBM round-trip.
    xw_all = jnp.dot(x_ref[...] - mu, us,
                     preferred_element_type=jnp.float32)          # (N_pad, D)
    if tile_rows == n_pad:
        xw_row = xw_all
    else:
        row0 = pl.multiple_of(i * tile_rows, tile_rows)
        xw_row = jnp.dot(x_ref[pl.ds(row0, tile_rows), :] - mu, us,
                         preferred_element_type=jnp.float32)      # (TR, D)

    # Gram identity: d[i,j] = |xi|^2 + |xj|^2 - 2 xi.xj   (no (N,N,D) tensor).
    gram = lax.dot_general(xw_row, xw_all, (((1,), (1,)), ((), ())),
                           preferred_element_type=jnp.float32)    # (TR, N_pad)
    sq_i = jnp.sum(xw_row * xw_row, axis=1, keepdims=True)        # (TR, 1)
    # |xj|^2 laid out along lanes.  Tiny ones-matmul, once per tile
    # (amortized over the whole (TR, N_pad) slab); kept over an (N,1)->(1,N)
    # transpose for robust lowering.
    sq_j = lax.dot_general(jnp.ones((1, d_feat), jnp.float32), xw_all * xw_all,
                           (((1,), (1,)), ((), ())),
                           preferred_element_type=jnp.float32)    # (1, N_pad)
    # Clamp tiny negatives from cancellation (diagonal) to match the
    # pairwise-difference reference.
    dist = jnp.maximum(sq_i + sq_j - 2.0 * gram, 0.0)             # (TR, N_pad)

    sh = dist - shift
    if n_valid != n_pad:  # static: mask padded rows/cols out of the sums
        rid = lax.broadcasted_iota(jnp.int32, dist.shape, 0) + i * tile_rows
        cid = lax.broadcasted_iota(jnp.int32, dist.shape, 1)
        sh = jnp.where(jnp.logical_and(rid < n_valid, cid < n_valid), sh, 0.0)

    def _sum_all(v):  # lane reduction then sublane reduction -> (1, 1)
        return jnp.sum(jnp.sum(v, axis=1, keepdims=True), axis=0, keepdims=True)

    s1_ref[0] = _sum_all(sh)
    s2_ref[0] = _sum_all(sh * sh)


# ---------------------------------------------------------------- wrappers --

def _whiten_factors(x):
    """Column mean, pre-scaled whitening basis, and analytic distance shift.

    cov is computed as E[x x^T] - mu mu^T so the centered xc never hits HBM.
    """
    x = x.astype(jnp.float32)
    n = x.shape[0]
    mu = jnp.mean(x, axis=0, keepdims=True)                          # (1, D)
    cov = (jnp.dot(x.T, x, precision=lax.Precision.HIGHEST) / n
           - jnp.dot(mu.T, mu, precision=lax.Precision.HIGHEST))     # (D, D)
    # TODO(synk): SVD has no Pallas equivalent; computed with jnp.linalg.svd.
    u, s, _ = jnp.linalg.svd(cov)
    us = (u / jnp.sqrt(s + 1e-5)[None, :]).astype(jnp.float32)
    # Exact mean of the whitened sq-dist matrix (xw is mean-centered):
    #   mean_ij |xw_i - xw_j|^2 = 2/N * sum_i |xw_i|^2 = 2 * sum_k s_k/(s_k+eps)
    # Used only as the numerical shift of the single-pass accumulation.
    shift = 2.0 * jnp.sum(s / (s + 1e-5))
    return mu, us, shift.astype(jnp.float32)


def _partial_sums_pallas(x, mu, us, shift):
    n, d = x.shape
    tr, n_pad, g = _choose_tiling(n)
    x = x.astype(jnp.float32)
    if n_pad != n:
        x = jnp.pad(x, ((0, n_pad - n), (0, 0)))
    shift2d = jnp.reshape(shift, (1, 1)).astype(jnp.float32)

    kernel = functools.partial(_partial_stats_kernel,
                               n_valid=n, n_pad=n_pad, tile_rows=tr)

    flops = g * (2 * n_pad * d * d + 2 * tr * d * d
                 + 2 * tr * n_pad * d + 2 * n_pad * d)
    bytes_accessed = 4 * (n_pad * d + d + d * d + 1 + 2 * g)

    s1, s2 = pl.pallas_call(
        kernel,
        out_shape=(jax.ShapeDtypeStruct((g, 1, 1), jnp.float32),
                   jax.ShapeDtypeStruct((g, 1, 1), jnp.float32)),
        grid_spec=pltpu.PrefetchScalarGridSpec(
            num_scalar_prefetch=0,
            grid=(g,),
            in_specs=[
                pl.BlockSpec((n_pad, d), lambda i: (0, 0)),   # x, VMEM-resident
                pl.BlockSpec((1, d), lambda i: (0, 0)),       # column mean
                pl.BlockSpec((d, d), lambda i: (0, 0)),       # whitening basis
                pl.BlockSpec(memory_space=pltpu.MemorySpace.SMEM),  # shift scalar
            ],
            out_specs=(
                pl.BlockSpec((1, 1, 1), lambda i: (i, 0, 0)),
                pl.BlockSpec((1, 1, 1), lambda i: (i, 0, 0)),
            ),
        ),
        compiler_params=pltpu.CompilerParams(
            dimension_semantics=("parallel",),
            vmem_limit_bytes=48 * 1024 * 1024,
        ),
        cost_estimate=pl.CostEstimate(flops=flops, transcendentals=0,
                                      bytes_accessed=bytes_accessed),
    )(x, mu, us, shift2d)
    return s1, s2


def _dist_stats(x):
    """(mean, std) of the whitened pairwise squared-distance matrix."""
    n = x.shape[0]
    mu, us, shift = _whiten_factors(x)
    s1, s2 = _partial_sums_pallas(x, mu, us, shift)
    npairs = float(n * n)
    total1 = jnp.sum(s1)
    total2 = jnp.sum(s2)
    mean = shift + total1 / npairs
    # torch.Tensor.std() default: unbiased (n^2 - 1); shifted-sum identity is
    # exact regardless of how close `shift` is to the true mean.
    var = (total2 - total1 * total1 / npairs) / (npairs - 1.0)
    std = jnp.sqrt(jnp.maximum(var, 0.0))
    return mean, std


def _smooth_l1(x):  # beta = 1
    ax = jnp.abs(x)
    return jnp.where(ax < 1.0, 0.5 * x * x, ax - 0.5)


class AltRegLoss:
    """JAX/Pallas port of torchnurbs.loss.AltRegLoss (whitening_num_pcs=None)."""

    def __init__(self, initial_outputs, whitening_num_pcs=None):
        assert whitening_num_pcs is None, "only full-PC whitening supported"
        om, os_ = _dist_stats(initial_outputs)
        self.original_mean = om
        self.original_std = os_

    def __call__(self, outputs):
        # forward(): SmoothL1(new_stats, original_stats) * 1e4
        # (mean over the 2 stats and the *1e4 folded into one scalar: 5000).
        nm, ns = _dist_stats(outputs)
        return (_smooth_l1(nm - self.original_mean)
                + _smooth_l1(ns - self.original_std)) * 5000.0


# --------------------------------------------------------------------- main --

if __name__ == "__main__":
    key = jax.random.PRNGKey(0)
    k1, k2 = jax.random.split(key)
    N, D = 32, 16
    initial_outputs = jax.random.normal(k1, (N, D), dtype=jnp.float32)
    outputs = initial_outputs + 0.1 * jax.random.normal(k2, (N, D), dtype=jnp.float32)

    reg = AltRegLoss(initial_outputs)
    loss = jax.jit(reg.__call__)(outputs)
    loss = jax.block_until_ready(loss)

    # pure-jnp reference mirroring the PyTorch spec (explicit pairwise diffs)
    def ref_whiten(x):
        xc = x - x.mean(0)
        cov = jnp.dot(xc.T, xc, precision=lax.Precision.HIGHEST) / x.shape[0]
        u, s, _ = jnp.linalg.svd(cov)
        return jnp.dot(xc, u, precision=lax.Precision.HIGHEST) / jnp.sqrt(s + 1e-5)

    def ref_dist(a):
        dm = a[:, None] - a[None]
        return jnp.einsum('ijk,ijk->ij', dm, dm, precision=lax.Precision.HIGHEST)

    def ref_stats(x):
        dm = ref_dist(ref_whiten(x))
        mean = dm.mean()
        std = jnp.sqrt(jnp.sum((dm - mean) ** 2) / (dm.size - 1))  # unbiased
        return mean, std

    def sl1(x):
        ax = jnp.abs(x)
        return jnp.where(ax < 1.0, 0.5 * x * x, ax - 0.5)

    om, os_ = ref_stats(initial_outputs)
    nm, ns = ref_stats(outputs)
    expected = 0.5 * (sl1(nm - om) + sl1(ns - os_)) * 10000.0

    assert jnp.allclose(loss, expected, rtol=2e-2, atol=2e-2), (float(loss), float(expected))
    print("KERNEL_OK")
</pallas_src>

<mosaic_0001>
module attributes {stable_mosaic.version = 11 : i64} {
  func.func @_partial_stats_kernel(%arg0: i32, %arg1: memref<32x16xf32, #tpu.memory_space<vmem>>, %arg2: memref<1x16xf32, #tpu.memory_space<vmem>>, %arg3: memref<16x16xf32, #tpu.memory_space<vmem>>, %arg4: memref<1x1xf32, #tpu.memory_space<smem>>, %arg5: memref<1x1x1xf32, #tpu.memory_space<vmem>>, %arg6: memref<1x1x1xf32, #tpu.memory_space<vmem>>) attributes {dimension_semantics = [#tpu.dimension_semantics<parallel>], iteration_bounds = array<i64: 1>, scalar_prefetch = 0 : i64, scratch_operands = 0 : i64, tpu.core_type = #tpu.core_type<tc>, window_params = [{pipeline_mode = #tpu.pipeline_mode<synchronous>, transform_indices = @transform_0, window_bounds = array<i64: 32, 16>}, {pipeline_mode = #tpu.pipeline_mode<synchronous>, transform_indices = @transform_1, window_bounds = array<i64: 1, 16>}, {pipeline_mode = #tpu.pipeline_mode<synchronous>, transform_indices = @transform_2, window_bounds = array<i64: 16, 16>}, {transform_indices = @transform_3, window_bounds = array<i64: 1, 1>}, {transform_indices = @transform_4, window_bounds = array<i64: 1, 1, 1>}, {transform_indices = @transform_5, window_bounds = array<i64: 1, 1, 1>}]} {
    %c0 = arith.constant 0 : index
    %c0_0 = arith.constant 0 : index
    %0 = memref.load %arg4[%c0, %c0_0] : memref<1x1xf32, #tpu.memory_space<smem>>
    %c0_1 = arith.constant 0 : index
    %c0_2 = arith.constant 0 : index
    %1 = vector.load %arg2[%c0_1, %c0_2] : memref<1x16xf32, #tpu.memory_space<vmem>>, vector<1x16xf32>
    %c0_3 = arith.constant 0 : index
    %c0_4 = arith.constant 0 : index
    %2 = vector.load %arg3[%c0_3, %c0_4] : memref<16x16xf32, #tpu.memory_space<vmem>>, vector<16x16xf32>
    %c0_5 = arith.constant 0 : index
    %c0_6 = arith.constant 0 : index
    %3 = vector.load %arg1[%c0_5, %c0_6] : memref<32x16xf32, #tpu.memory_space<vmem>>, vector<32x16xf32>
    %4 = vector.broadcast %1 : vector<1x16xf32> to vector<32x16xf32>
    %5 = arith.subf %3, %4 : vector<32x16xf32>
    %cst = arith.constant dense<0.000000e+00> : vector<32x16xf32>
    %6 = tpu.matmul %5, %2, %cst {dimension_numbers = #tpu.dot_dimension_numbers<[1], [0], [0], [1], [0, 0, 1, 1], [], []>} : vector<32x16xf32>, vector<16x16xf32>, vector<32x16xf32> -> vector<32x16xf32>
    %cst_7 = arith.constant dense<0.000000e+00> : vector<32x32xf32>
    %7 = tpu.matmul %6, %6, %cst_7 {dimension_numbers = #tpu.dot_dimension_numbers<[1], [1], [0], [0], [0, 0, 1, 0], [], []>} : vector<32x16xf32>, vector<32x16xf32>, vector<32x32xf32> -> vector<32x32xf32>
    %8 = arith.mulf %6, %6 : vector<32x16xf32>
    %cst_8 = arith.constant dense<0.000000e+00> : vector<32xf32>
    %9 = vector.multi_reduction <add>, %8, %cst_8 [1] : vector<32x16xf32> to vector<32xf32>
    %10 = vector.shape_cast %9 : vector<32xf32> to vector<32x1xf32>
    %cst_9 = arith.constant 1.000000e+00 : f32
    %11 = vector.broadcast %cst_9 : f32 to vector<1x16xf32>
    %12 = arith.mulf %6, %6 : vector<32x16xf32>
    %cst_10 = arith.constant dense<0.000000e+00> : vector<1x32xf32>
    %13 = tpu.matmul %11, %12, %cst_10 {dimension_numbers = #tpu.dot_dimension_numbers<[1], [1], [0], [0], [0, 0, 1, 0], [], []>} : vector<1x16xf32>, vector<32x16xf32>, vector<1x32xf32> -> vector<1x32xf32>
    %14 = vector.broadcast %10 : vector<32x1xf32> to vector<32x32xf32>
    %15 = vector.broadcast %13 : vector<1x32xf32> to vector<32x32xf32>
    %16 = arith.addf %14, %15 : vector<32x32xf32>
    %cst_11 = arith.constant 2.000000e+00 : f32
    %17 = vector.broadcast %cst_11 : f32 to vector<32x32xf32>
    %18 = arith.mulf %17, %7 : vector<32x32xf32>
    %19 = arith.subf %16, %18 : vector<32x32xf32>
    %cst_12 = arith.constant 0.000000e+00 : f32
    %20 = vector.broadcast %cst_12 : f32 to vector<32x32xf32>
    %21 = arith.maximumf %19, %20 : vector<32x32xf32>
    %22 = vector.broadcast %0 : f32 to vector<32x32xf32>
    %23 = arith.subf %21, %22 : vector<32x32xf32>
    %cst_13 = arith.constant dense<0.000000e+00> : vector<32xf32>
    %24 = vector.multi_reduction <add>, %23, %cst_13 [1] : vector<32x32xf32> to vector<32xf32>
    %25 = vector.shape_cast %24 : vector<32xf32> to vector<32x1xf32>
    %cst_14 = arith.constant dense<0.000000e+00> : vector<1xf32>
    %26 = vector.multi_reduction <add>, %25, %cst_14 [0] : vector<32x1xf32> to vector<1xf32>
    %27 = vector.shape_cast %26 : vector<1xf32> to vector<1x1xf32>
    %c0_15 = arith.constant 0 : index
    %c0_16 = arith.constant 0 : index
    %c0_17 = arith.constant 0 : index
    %28 = vector.load %arg5[%c0_15, %c0_16, %c0_17] : memref<1x1x1xf32, #tpu.memory_space<vmem>>, vector<1x1x1xf32>
    %29 = vector.shape_cast %28 : vector<1x1x1xf32> to vector<1x1xf32>
    %30 = vector.shape_cast %27 : vector<1x1xf32> to vector<1x1x1xf32>
    tpu.vector_store %arg5[%c0_15, %c0_16, %c0_17], %30 {strides = array<i32>} : memref<1x1x1xf32, #tpu.memory_space<vmem>>, vector<1x1x1xf32>,
    %31 = arith.mulf %23, %23 : vector<32x32xf32>
    %cst_18 = arith.constant dense<0.000000e+00> : vector<32xf32>
    %32 = vector.multi_reduction <add>, %31, %cst_18 [1] : vector<32x32xf32> to vector<32xf32>
    %33 = vector.shape_cast %32 : vector<32xf32> to vector<32x1xf32>
    %cst_19 = arith.constant dense<0.000000e+00> : vector<1xf32>
    %34 = vector.multi_reduction <add>, %33, %cst_19 [0] : vector<32x1xf32> to vector<1xf32>
    %35 = vector.shape_cast %34 : vector<1xf32> to vector<1x1xf32>
    %c0_20 = arith.constant 0 : index
    %c0_21 = arith.constant 0 : index
    %c0_22 = arith.constant 0 : index
    %36 = vector.load %arg6[%c0_20, %c0_21, %c0_22] : memref<1x1x1xf32, #tpu.memory_space<vmem>>, vector<1x1x1xf32>
    %37 = vector.shape_cast %36 : vector<1x1x1xf32> to vector<1x1xf32>
    %38 = vector.shape_cast %35 : vector<1x1xf32> to vector<1x1x1xf32>
    tpu.vector_store %arg6[%c0_20, %c0_21, %c0_22], %38 {strides = array<i32>} : memref<1x1x1xf32, #tpu.memory_space<vmem>>, vector<1x1x1xf32>,
    return
  }
  func.func @transform_0(%arg0: i32) -> (i32, i32) {
    %c0_i32 = arith.constant 0 : i32
    %c0_i32_0 = arith.constant 0 : i32
    %c0_i32_1 = arith.constant 0 : i32
    return %c0_i32, %c0_i32_0 : i32, i32
  }
  func.func @transform_1(%arg0: i32) -> (i32, i32) {
    %c0_i32 = arith.constant 0 : i32
    %c0_i32_0 = arith.constant 0 : i32
    %c0_i32_1 = arith.constant 0 : i32
    return %c0_i32, %c0_i32_0 : i32, i32
  }
  func.func @transform_2(%arg0: i32) -> (i32, i32) {
    %c0_i32 = arith.constant 0 : i32
    %c0_i32_0 = arith.constant 0 : i32
    %c0_i32_1 = arith.constant 0 : i32
    return %c0_i32, %c0_i32_0 : i32, i32
  }
  func.func @transform_3(%arg0: i32) -> (i32, i32) {
    %c0_i32 = arith.constant 0 : i32
    %c0_i32_0 = arith.constant 0 : i32
    %c0_i32_1 = arith.constant 0 : i32
    return %c0_i32, %c0_i32_0 : i32, i32
  }
  func.func @transform_4(%arg0: i32) -> (i32, i32, i32) {
    %c0_i32 = arith.constant 0 : i32
    %c0_i32_0 = arith.constant 0 : i32
    %c0_i32_1 = arith.constant 0 : i32
    return %arg0, %c0_i32, %c0_i32_0 : i32, i32, i32
  }
  func.func @transform_5(%arg0: i32) -> (i32, i32, i32) {
    %c0_i32 = arith.constant 0 : i32
    %c0_i32_0 = arith.constant 0 : i32
    %c0_i32_1 = arith.constant 0 : i32
    return %arg0, %c0_i32, %c0_i32_0 : i32, i32, i32
  }
}

</mosaic_0001>

<bundles_post_ra>
// kernel: tpu_custom_call.1
= control target key start
LH: loop header
LB: loop body
LE: loop exit
PB: predicated region body
PF: predicated region fallthrough
CT: control target
= control target key end

     0   :  { %12 = vsyncpa [#allocation4], 0  ;;  %vm40_vm0 = vcmask 130048   ;;  %s720_s0 = inlined_call_operand.vmem [shape: f32[32,16], index: 0, kind: input, shape index: {}]   ;;  %s721_s1 = inlined_call_operand.vmem [shape: f32[1,16], index: 1, kind: input, shape index: {}]   ;;  %s722_s2 = inlined_call_operand.vmem [shape: f32[16,16], index: 2, kind: input, shape index: {}]   ;;  %s723_s3 = inlined_call_operand.<no memory space> [shape: f32[1,1], index: 3, kind: input, shape index: {}]   ;;  %s724_s4 = inlined_call_operand.hbm [shape: f32[1,1,1], index: 4, kind: output, shape index: {0}]   ;;  %s725_s5 = inlined_call_operand.hbm [shape: f32[1,1,1], index: 5, kind: output, shape index: {1}]  }
   0x1   :  { %v24_v0 = vld [vmem:[%s722_s2] sm:$0xff]  ;;  %v25_v1 = vld [vmem:[%s722_s2 + $0x8] sm:$0xff]  ;;  %v28_v6 = vld [vmem:[%s720_s0 + $0x10] sm:$0xff] }
   0x2   :  { %v439_v2 = vld [vmem:[%s721_s1] ss:$0 sm:$0xff]  ;;  %v511_v3 = vpack.c.bf16 %v25_v1, %v24_v0  ;;  %v27_v5 = vld [vmem:[%s720_s0 + $0x8] sm:$0xff] }
   0x3   :  { %v26_v4 = vld [vmem:[%s720_s0] sm:$0xff] }
   0x4   :  { %v36_v7 = vsub.f32 %v26_v4, %v439_v2 }
   0x5   :  { %13 = vsyncpa [#allocation6], 0  ;;  %512 = vmatprep.subr.bf16.mxu0 %v511_v3  ;;  %v37_v8 = vsub.f32 %v27_v5, %v439_v2  ;;  %v38_v9 = vsub.f32 %v28_v6, %v439_v2  ;;  %v29_v10 = vld [vmem:[%s720_s0 + $0x18] sm:$0xff]  ;;  %v589_v12 = vmov 0.0|0.0   ;;  %vm590_vm1 = vmmov 0   ;;  %s594_s7 = smov [#allocation5]  }
   0x6   :  { %514 = vmatpush3.bf16.msra.mxu0 %v511_v3  ;;  %480 = vmatprep.mubr.msk.f32.mxu0 %vm40_vm0, %v36_v7  ;;  %v39_v11 = vsub.f32 %v29_v10, %v439_v2  ;;  %v591_v13 = vmov 0.0   ;;  %vm652_vm2 = vmpackc.low %vm40_vm0, %vm40_vm0  ;;  %v592_v31 = vmov 1.0   ;;  %v336_v32 = vlaneseq  ;;  %s427_s8 = sshll.u32 %s594_s7, 4  ;;  %s688_s8 = int_to_ptr.vmem [resolvable:$true] %s427_s8 }
   0x7   :  { %527 = vmatprep.subr.bf16.mxu0 %v589_v12  ;;  %v356_v57 = vstv %s723_s3  ;;  %vm361_vm3 = vcmask 261120   ;;  %s593_s3 = smov [#allocation3]   ;;  %vm383_vm4 = vcmask 0  }
   0x8   :  { %v337_v33 = vshrl.u32 %v336_v32, 7  ;;  %s417_s6 = sshll.u32 %s593_s3, 4  ;;  %s418_s6 = int_to_ptr.vmem [resolvable:$true] %s417_s6 }
   0x9   :  { %481 = vmatmul.mubr.msk.f32.vlgmr.msra.gmra.mrb[0].mxu0 %vm40_vm0, %v37_v8  ;;  %s541_s9 = scalar_lea.vmem %s418_s6, 16  ;;  %s545_s10 = scalar_lea.vmem %s418_s6, 32 }
   0xa   :  { %483 = vmatprep.mubr.msk.f32.mxu0 %vm40_vm0, %v38_v9  ;;  %v338_v36 = vsub.s32 0, %v337_v33  ;;  %p542_p0 = scmp.ne.s32.totalorder %s418_s6, %s541_s9  ;;  %p546_p1 = scmp.lt.s32.totalorder %s418_s6, %s418_s6 }
   0xb   :  { %p547_p2 = scmp.lt.s32.totalorder %s545_s10, %s541_s9 }
   0xd   :  { %484 = vmatmul.mubr.msk.f32.gmra.mrb[2].mxu0 %vm40_vm0, %v39_v11  ;;  %p548_p3 = por %p547_p2, %p546_p1 }
   0xe   :  { %508 = vmatprep.mubr.msk.f32.mxu0 %vm590_vm1, %v591_v13 }
   0xf   :  { %p549_p4 = pnand %p548_p3, %p542_p0 }
  0xdc   :  { %v482_v14 = vpop.f32.mrb[0].mxu0 }
  0xdd   :  { %v236_v15 = vmul.f32 %v482_v14, %v482_v14  ;;  %v119_v16 = vpop.f32.mrb[1].mxu0 }
  0xde   :  { %494 = vmatprep.mubr.msk.f32.mxu1 %vm40_vm0, %v119_v16  ;;  %v515_v18 = vpack.c.bf16 %v482_v14, %v119_v16  ;;  %v235_v19 = vmul.f32 %v119_v16, %v119_v16 }
  0xdf   :  { %v242_v27 = vsel %vm40_vm0, %v236_v15, 0.0 }
  0xe0   :  { %v485_v20 = vpop.f32.mrb[2].mxu0  ;;  %517 = vmatprep.subr.msk.bf16.mxu1 %vm652_vm2, %v515_v18  ;;  %v239_v21 = vsel %vm40_vm0, %v235_v19, 0.0  ;;  %v528_v22 = vpack.c.bf16 %v236_v15, %v235_v19 }
  0xe1   :  { %240 = vadd.xlane.f32.xlu0 %v239_v21  ;;  %v129_v23 = vpop.f32.mrb[3].mxu0  ;;  %520 = vmatpush3.bf16.xpose.msk.msra.mxu1 %vm652_vm2, %v515_v18  ;;  %v238_v24 = vmul.f32 %v485_v20, %v485_v20 }
  0xe2   :  { %v521_v25 = vpack.c.bf16 %v485_v20, %v129_v23  ;;  %530 = vmatpush3.bf16.xpose.msk.msra.mxu0 %vm652_vm2, %v528_v22  ;;  %v237_v26 = vmul.f32 %v129_v23, %v129_v23 }
  0xe3   :  { %531 = vmatprep.subr.bf16.mxu0 %v589_v12  ;;  %v248_v30 = vsel %vm40_vm0, %v238_v24, 0.0 }
  0xe4   :  { %v245_v28 = vsel %vm40_vm0, %v237_v26, 0.0  ;;  %523 = vmatprep.subr.msk.bf16.mxu1 %vm652_vm2, %v521_v25  ;;  %v532_v29 = vpack.c.bf16 %v238_v24, %v237_v26 }
  0xe5   :  { %243 = vadd.xlane.f32.xlu0 %v242_v27  ;;  %246 = vadd.xlane.f32.xlu1 %v245_v28 }
  0xe9   :  { %249 = vadd.xlane.f32.xlu1 %v248_v30  ;;  %526 = vmatpush3.bf16.xpose.msk.msra.mxu1 %vm652_vm2, %v521_v25 }
  0xea   :  { %534 = vmatpush3.bf16.xpose.msk.msra.mxu0 %vm652_vm2, %v532_v29 }
  0xf0   :  { %495 = vmatmul.mubr.msk.f32.vlgmr.msra.gmra.mrb[0].mxu1 %vm40_vm0, %v482_v14 }
  0xf1   :  { %497 = vmatprep.mubr.msk.f32.mxu1 %vm40_vm0, %v129_v23  ;;  %509 = vmatmul.mubr.msk.f32.vlgmr.msra.gmra.mrb[4].mxu0 %vm40_vm0, %v592_v31 }
  0xf4   :  { %498 = vmatmul.mubr.msk.f32.gmra.mrb[2].mxu1 %vm40_vm0, %v485_v20 }
 0x16e   :  { %v241_v34 = vpop.xlane.xlu0 %240 }
 0x172   :  { %v247_v35 = vpop.xlane.xlu1 %246  ;;  %v244_v42 = vpop.xlane.xlu0 %243 }
 0x176   :  { %v250_v43 = vpop.xlane.xlu1 %249 }
 0x1c3   :  { %v496_v37 = vpop.f32.mrb[0].mxu1 }
 0x1c4   :  { %v216_v38 = vpop.f32.mrb[1].mxu1  ;;  %v332_v39 = vpop.f32.mrb[4].mxu0  ;;  %v345_v44 = vmul.f32 2.0, %v496_v37 }
 0x1c5   :  { %v339_v40 = vrot.slane %v332_v39, %v338_v36  ;;  %v510_v41 = vpop.f32.mrb[5].mxu0  ;;  %v344_v45 = vmul.f32 2.0, %v216_v38 }
 0x1c7   :  { %v499_v46 = vpop.f32.mrb[2].mxu1  ;;  %v343_v47 = vadd.f32 %v339_v40, %v250_v43  ;;  %v341_v48 = vadd.f32 %v339_v40, %v244_v42  ;;  %v340_v49 = vadd.f32 %v339_v40, %v241_v34  ;;  %v342_v52 = vadd.f32 %v339_v40, %v247_v35 }
 0x1c8   :  { %v347_v50 = vmul.f32 2.0, %v499_v46  ;;  %v226_v51 = vpop.f32.mrb[3].mxu1 }
 0x1c9   :  { %v346_v53 = vmul.f32 2.0, %v226_v51  ;;  %v349_v54 = vsub.f32 %v341_v48, %v345_v44  ;;  %v348_v55 = vsub.f32 %v340_v49, %v344_v45 }
 0x1ca   :  { %v351_v56 = vsub.f32 %v343_v47, %v347_v50 }
 0x1cb   :  { %v350_v58 = vsub.f32 %v342_v52, %v346_v53  ;;  %v353_v59 = vmax.f32 %v349_v54, 0.0  ;;  %v352_v60 = vmax.f32 %v348_v55, 0.0 }
 0x1cc   :  { %v355_v0 = vmax.f32 %v351_v56, 0.0 }
 0x1cd   :  { %v354_v61 = vmax.f32 %v350_v58, 0.0  ;;  %v358_v62 = vsub.f32 %v353_v59, %v356_v57  ;;  %v357_v63 = vsub.f32 %v352_v60, %v356_v57 }
 0x1ce   :  { %v360_v9 = vsub.f32 %v355_v0, %v356_v57 }
 0x1cf   :  { %v359_v1 = vsub.f32 %v354_v61, %v356_v57  ;;  %v365_v2 = vsel %vm361_vm3, %v358_v62, 0.0  ;;  %v362_v3 = vsel %vm361_vm3, %v357_v63, 0.0  ;;  %v386_v4 = vmul.f32 %v358_v62, %v358_v62 }
 0x1d0   :  { %366 = vadd.xlane.f32.xlu1 %v365_v2  ;;  %363 = vadd.xlane.f32.xlu0 %v362_v3  ;;  %v385_v5 = vmul.f32 %v357_v63, %v357_v63  ;;  %v388_v12 = vmul.f32 %v360_v9, %v360_v9  ;;  %v371_v14 = vsel %vm361_vm3, %v360_v9, 0.0 }
 0x1d1   :  { %v392_v6 = vsel %vm361_vm3, %v386_v4, 0.0  ;;  %v387_v8 = vmul.f32 %v359_v1, %v359_v1  ;;  %v368_v11 = vsel %vm361_vm3, %v359_v1, 0.0 }
 0x1d2   :  { %v389_v7 = vsel %vm361_vm3, %v385_v5, 0.0  ;;  %v398_v13 = vsel %vm361_vm3, %v388_v12, 0.0 }
 0x1d3   :  { %v395_v10 = vsel %vm361_vm3, %v387_v8, 0.0 }
 0x1d4   :  { %393 = vadd.xlane.f32.xlu1 %v392_v6  ;;  %390 = vadd.xlane.f32.xlu0 %v389_v7 }
 0x1d8   :  { %396 = vadd.xlane.f32.xlu1 %v395_v10  ;;  %369 = vadd.xlane.f32.xlu0 %v368_v11 }
 0x1dc   :  { %399 = vadd.xlane.f32.xlu1 %v398_v13  ;;  %372 = vadd.xlane.f32.xlu0 %v371_v14 }
 0x25d   :  { %v367_v15 = vpop.xlane.xlu1 %366  ;;  %v364_v16 = vpop.xlane.xlu0 %363 }
 0x25e   :  { %v374_v21 = vadd.f32 %v367_v15, %v364_v16 }
 0x261   :  { %v394_v17 = vpop.xlane.xlu1 %393  ;;  %v391_v18 = vpop.xlane.xlu0 %390 }
 0x262   :  { %v401_v22 = vadd.f32 %v394_v17, %v391_v18 }
 0x265   :  { %v397_v19 = vpop.xlane.xlu1 %396  ;;  %v370_v20 = vpop.xlane.xlu0 %369 }
 0x266   :  { %v402_v23 = vadd.f32 %v401_v22, %v397_v19  ;;  %v375_v24 = vadd.f32 %v374_v21, %v370_v20 }
 0x269   :  { %v400_v25 = vpop.xlane.xlu1 %399  ;;  %v373_v26 = vpop.xlane.xlu0 %372 }
 0x26a   :  { %v403_v27 = vadd.f32 %v402_v23, %v400_v25  ;;  %v376_v28 = vadd.f32 %v375_v24, %v373_v26 }
 0x26c   :  { %v404_v29 = vrot.slane %v403_v27, 4  ;;  %v377_v30 = vrot.slane %v376_v28, 4 }
 0x26e   :  { %v405_v31 = vadd.f32 %v404_v29, %v403_v27  ;;  %v378_v32 = vadd.f32 %v377_v30, %v376_v28 }
 0x270   :  { %v406_v33 = vrot.slane %v405_v31, 2  ;;  %v379_v34 = vrot.slane %v378_v32, 2 }
 0x272   :  { %v407_v35 = vadd.f32 %v406_v33, %v405_v31  ;;  %v380_v36 = vadd.f32 %v379_v34, %v378_v32 }
 0x274   :  { %v381_v37 = vrot.slane %v380_v36, 1  ;;  %v408_v38 = vrot.slane %v407_v35, 1 }
 0x276   :  { %v382_v39 = vadd.f32 %v381_v37, %v380_v36  ;;  %v409_v40 = vadd.f32 %v408_v38, %v407_v35 }
 0x278   :  { %384 = vst.msk [vmem:[#allocation3] sm:$0x1] %vm383_vm4, %v382_v39  ;;  %410 = vst.msk [vmem:[#allocation5] sm:$0x1] %vm383_vm4, %v409_v40 }
 0x279   :  { %552 = shalt.err (!%p549_p4)
}
 0x27a   :  { %s553_s13 = scalar_lea.hbm %s724_s4, 16 }
 0x27b   :  { %p554_p5 = scmp.ne.s32.totalorder %s724_s4, %s553_s13  ;;  %p557_p6 = scmp.lt.u32.totalorder %s553_s13, %s724_s4 }
 0x27d   :  { %p559_p7 = pnand %p557_p6, %p554_p5 }
 0x27f   :  { %562 = shalt.err (!%p559_p7)
}
 0x280   :  { %420 = dma.vmem_to_hbm [thread:$0]  %s418_s6, 16, %s724_s4, [#allocation4]  }
 0x281   :  { %s563_s20 = scalar_lea.vmem %s688_s8, 16  ;;  %s567_s21 = scalar_lea.vmem %s688_s8, 32 }
 0x282   :  { %p564_p8 = scmp.ne.s32.totalorder %s688_s8, %s563_s20  ;;  %p568_p9 = scmp.lt.s32.totalorder %s688_s8, %s688_s8 }
 0x283   :  { %p569_p10 = scmp.lt.s32.totalorder %s567_s21, %s563_s20 }
 0x285   :  { %p570_p11 = por %p569_p10, %p568_p9 }
 0x287   :  { %p571_p12 = pnand %p570_p11, %p564_p8 }
 0x289   :  { %574 = shalt.err (!%p571_p12)
}
 0x28a   :  { %s575_s24 = scalar_lea.hbm %s725_s5, 16 }
 0x28b   :  { %p576_p13 = scmp.ne.s32.totalorder %s725_s5, %s575_s24  ;;  %p579_p0 = scmp.lt.u32.totalorder %s575_s24, %s725_s5 }
 0x28d   :  { %p581_p1 = pnand %p579_p0, %p576_p13 }
 0x28f   :  { %584 = shalt.err (!%p581_p1)
}
 0x290   :  { %430 = dma.vmem_to_hbm [thread:$0]  %s688_s8, 16, %s725_s5, [#allocation6]  }
 0x291   :  { %585 = dma.done.wait [#allocation4], 16  }
 0x292   :  { %586 = vsyncadd [#allocation4], 4294967280 }
 0x293   :  { %587 = dma.done.wait [#allocation6], 16  }
 0x294   :  { %588 = vsyncadd [#allocation6], 4294967280 }
 0x295   :  { %437 = vsyncpa [#allocation4], 1 }
 0x296   :  { %438 = vsyncpa [#allocation6], 1 }

</bundles_post_ra>
